<compile_context>
chip_gen: v5e
topology: v5e:2x2
jax: 0.10.0
libtpu: 0.0.40
codegen_flags: <defaults>
</compile_context>

<pallas_src>
import functools

import jax
import jax.numpy as jnp
from jax.experimental import pallas as pl
from jax.experimental.pallas import tpu as pltpu

EPS = 1e-5
_COMPILER_PARAMS = pltpu.CompilerParams(dimension_semantics=("parallel",))


# ---------------------------------------------------------------------------
# Kernels
# ---------------------------------------------------------------------------
def _masked(h, batch, tile, need_mask):
    """Zero rows past the true batch size (partial last tile) for BN stats."""
    if not need_mask:
        return h
    row = pl.program_id(0) * tile + jax.lax.broadcasted_iota(
        jnp.int32, (tile, 1), 0)
    return jnp.where(row < batch, h, 0.0)


def _layer1_kernel(boards_ref, dirs_ref, w1b_ref, w1d_ref, b1_ref,
                   h1_ref, stats_ref, *, batch, tile, need_mask):
    # Linear(788,128) split as boards@W1[:784] + dirs@W1[784:], then ReLU.
    xb = boards_ref[...].astype(jnp.bfloat16)
    xd = dirs_ref[...].astype(jnp.bfloat16)
    h = jnp.dot(xb, w1b_ref[...], preferred_element_type=jnp.float32)
    h = h + jnp.dot(xd, w1d_ref[...], preferred_element_type=jnp.float32)
    h = jnp.maximum(h + b1_ref[...], 0.0)
    hm = _masked(h, batch, tile, need_mask)
    stats_ref[0] = jnp.concatenate(
        [jnp.sum(hm, axis=0, keepdims=True),
         jnp.sum(hm * hm, axis=0, keepdims=True)], axis=0)
    h1_ref[...] = h.astype(jnp.bfloat16)


def _layer2_kernel(h1_ref, sc_ref, sh_ref, w2_ref, b2_ref,
                   h2_ref, stats_ref, *, batch, tile, need_mask):
    # Fused BatchNorm1d(128) scale/shift + Linear(128, 64->128pad) + ReLU.
    x = h1_ref[...].astype(jnp.float32) * sc_ref[...] + sh_ref[...]
    h = jnp.dot(x.astype(jnp.bfloat16), w2_ref[...],
                preferred_element_type=jnp.float32)
    h = jnp.maximum(h + b2_ref[...], 0.0)
    hm = _masked(h, batch, tile, need_mask)
    stats_ref[0] = jnp.concatenate(
        [jnp.sum(hm, axis=0, keepdims=True),
         jnp.sum(hm * hm, axis=0, keepdims=True)], axis=0)
    h2_ref[...] = h.astype(jnp.bfloat16)


def _layer3_kernel(h2_ref, sc_ref, sh_ref, w3_ref, b3_ref, o_ref):
    # Fused BatchNorm1d(64, padded to 128) scale/shift + Linear(64, 4->128pad).
    x = h2_ref[...].astype(jnp.float32) * sc_ref[...] + sh_ref[...]
    o_ref[...] = jnp.dot(x.astype(jnp.bfloat16), w3_ref[...],
                         preferred_element_type=jnp.float32) + b3_ref[...]


# ---------------------------------------------------------------------------
# Specs / wrapper
# ---------------------------------------------------------------------------
def _row_spec(tile, cols):
    return pl.BlockSpec((tile, cols), lambda i: (i, 0))


def _rep_spec(shape):
    zeros = tuple(0 for _ in shape)
    return pl.BlockSpec(shape, lambda i: zeros)


def _bn_scale_shift(stats, gamma, beta, batch):
    """Fold training-mode BatchNorm (biased var) into a (1,F) scale/shift."""
    total = jnp.sum(stats, axis=0)                              # (2, F)
    mean = total[0] / batch
    var = jnp.maximum(total[1] / batch - mean * mean, 0.0)
    scale = gamma * jax.lax.rsqrt(var + EPS)                    # (1, F)
    shift = beta - mean * scale
    return scale, shift


def fc_snake_forward(boards, directions, kp, *, max_tile=512):
    """boards: (B,28,28) f32, directions: (B,4) f32 -> (B,4) f32 logits."""
    B = boards.shape[0]
    boards2d = boards.reshape(B, 28 * 28)       # contiguous reshape: no copy

    TB = B if B <= max_tile else max_tile       # max_tile is a multiple of 8
    num_tiles = pl.cdiv(B, TB)
    need_mask = (B % TB) != 0                   # partial last tile
    kw = dict(batch=B, tile=TB, need_mask=need_mask)
    stats_spec = pl.BlockSpec((1, 2, 128), lambda i: (i, 0, 0))
    stats_shape = jax.ShapeDtypeStruct((num_tiles, 2, 128), jnp.float32)

    # Tiles are a few MB, so no vmem_limit_bytes override is needed on any gen.

    # --- pass 1: Linear(788,128)+ReLU, per-tile BN1 partial stats -----------
    h1, stats1 = pl.pallas_call(
        functools.partial(_layer1_kernel, **kw),
        grid=(num_tiles,),
        in_specs=[_row_spec(TB, 784), _row_spec(TB, 4),
                  _rep_spec((784, 128)), _rep_spec((4, 128)),
                  _rep_spec((1, 128))],
        out_specs=(_row_spec(TB, 128), stats_spec),
        out_shape=(jax.ShapeDtypeStruct((B, 128), jnp.bfloat16), stats_shape),
        compiler_params=_COMPILER_PARAMS,
    )(boards2d, directions, kp["w1b"], kp["w1d"], kp["b1"])
    scale1, shift1 = _bn_scale_shift(stats1, kp["g1"], kp["be1"], B)

    # --- pass 2: BN1 + Linear(128,64->128)+ReLU, per-tile BN2 stats ---------
    h2, stats2 = pl.pallas_call(
        functools.partial(_layer2_kernel, **kw),
        grid=(num_tiles,),
        in_specs=[_row_spec(TB, 128), _rep_spec((1, 128)), _rep_spec((1, 128)),
                  _rep_spec((128, 128)), _rep_spec((1, 128))],
        out_specs=(_row_spec(TB, 128), stats_spec),
        out_shape=(jax.ShapeDtypeStruct((B, 128), jnp.bfloat16), stats_shape),
        compiler_params=_COMPILER_PARAMS,
    )(h1, scale1, shift1, kp["w2p"], kp["b2p"])
    scale2, shift2 = _bn_scale_shift(stats2, kp["g2p"], kp["be2p"], B)

    # --- pass 3: BN2 + Linear(64,4->128), lane-dense output -----------------
    out = pl.pallas_call(
        _layer3_kernel,
        grid=(num_tiles,),
        in_specs=[_row_spec(TB, 128), _rep_spec((1, 128)), _rep_spec((1, 128)),
                  _rep_spec((128, 128)), _rep_spec((1, 128))],
        out_specs=_row_spec(TB, 128),
        out_shape=jax.ShapeDtypeStruct((B, 128), jnp.float32),
        compiler_params=_COMPILER_PARAMS,
    )(h2, scale2, shift2, kp["w3p"], kp["b3p"])
    return out[:, :4]


# ---------------------------------------------------------------------------
# Parameters
# ---------------------------------------------------------------------------
def init_params(key):
    """PyTorch-default init: Linear W,b ~ U(+-1/sqrt(fan_in)); BN gamma=1, beta=0."""
    def linear(k, fan_in, fan_out):
        kw_, kb_ = jax.random.split(k)
        bound = 1.0 / float(fan_in) ** 0.5
        w = jax.random.uniform(kw_, (fan_in, fan_out), jnp.float32, -bound, bound)
        b = jax.random.uniform(kb_, (1, fan_out), jnp.float32, -bound, bound)
        return w, b

    k1, k2, k3 = jax.random.split(key, 3)
    w1, b1 = linear(k1, 28 * 28 + 4, 128)
    w2, b2 = linear(k2, 128, 64)
    w3, b3 = linear(k3, 64, 4)
    return dict(
        w1=w1, b1=b1,
        g1=jnp.ones((1, 128), jnp.float32), be1=jnp.zeros((1, 128), jnp.float32),
        w2=w2, b2=b2,
        g2=jnp.ones((1, 64), jnp.float32), be2=jnp.zeros((1, 64), jnp.float32),
        w3=w3, b3=b3)


def prepare_params(p):
    """One-time repack: split W1, zero-pad 64/4-wide tensors to 128 lanes,
    store matmul weights in bf16 (biases / BN affine stay f32). Padding is
    exact: padded columns stay 0 through ReLU/BN and hit zero rows of W3."""
    def pad(a, rows, cols):
        out = jnp.zeros((rows, cols), jnp.float32)
        return out.at[: a.shape[0], : a.shape[1]].set(a)

    w1 = p["w1"]
    return dict(
        w1b=w1[:784].astype(jnp.bfloat16),
        w1d=w1[784:].astype(jnp.bfloat16),
        b1=p["b1"], g1=p["g1"], be1=p["be1"],
        w2p=pad(p["w2"], 128, 128).astype(jnp.bfloat16),
        b2p=pad(p["b2"], 1, 128),
        g2p=pad(p["g2"], 1, 128),
        be2p=pad(p["be2"], 1, 128),
        w3p=pad(p["w3"], 128, 128).astype(jnp.bfloat16),
        b3p=pad(p["b3"], 1, 128),
    )


# ---------------------------------------------------------------------------
# References
# ---------------------------------------------------------------------------
def _reference_forward(boards, directions, kp):
    """Plain-JAX mirror of the kernel math (same bf16 casts / padding)."""
    B = boards.shape[0]
    xb = boards.reshape(B, 784).astype(jnp.bfloat16)
    xd = directions.astype(jnp.bfloat16)

    def bn_scale_shift(h, gamma, beta):
        mean = jnp.mean(h, axis=0)
        var = jnp.maximum(jnp.mean(h * h, axis=0) - mean * mean, 0.0)
        scale = gamma * jax.lax.rsqrt(var + EPS)
        return scale, beta - mean * scale

    h = (jnp.dot(xb, kp["w1b"], preferred_element_type=jnp.float32)
         + jnp.dot(xd, kp["w1d"], preferred_element_type=jnp.float32))
    h = jnp.maximum(h + kp["b1"], 0.0)
    sc, sh = bn_scale_shift(h, kp["g1"], kp["be1"])
    x = h.astype(jnp.bfloat16).astype(jnp.float32) * sc + sh

    h = jnp.dot(x.astype(jnp.bfloat16), kp["w2p"],
                preferred_element_type=jnp.float32)
    h = jnp.maximum(h + kp["b2p"], 0.0)
    sc, sh = bn_scale_shift(h, kp["g2p"], kp["be2p"])
    x = h.astype(jnp.bfloat16).astype(jnp.float32) * sc + sh

    out = jnp.dot(x.astype(jnp.bfloat16), kp["w3p"],
                  preferred_element_type=jnp.float32) + kp["b3p"]
    return out[:, :4]


def _reference_forward_f32(boards, directions, p):
    """Full-f32 PyTorch-semantics reference (training-mode BN)."""
    B = boards.shape[0]
    x = jnp.concatenate([boards.reshape(B, -1), directions], axis=1)

    def bn(h, g, be):
        m = jnp.mean(h, axis=0, keepdims=True)
        v = jnp.mean((h - m) ** 2, axis=0, keepdims=True)
        return (h - m) * jax.lax.rsqrt(v + EPS) * g + be

    h = bn(jnp.maximum(x @ p["w1"] + p["b1"], 0.0), p["g1"], p["be1"])
    h = bn(jnp.maximum(h @ p["w2"] + p["b2"], 0.0), p["g2"], p["be2"])
    return h @ p["w3"] + p["b3"]


# ---------------------------------------------------------------------------
if __name__ == "__main__":
    key = jax.random.PRNGKey(0)
    kp_, kb_, kd_ = jax.random.split(key, 3)

    B = 8
    boards = jax.random.normal(kb_, (B, 28, 28), jnp.float32)
    directions = jax.random.normal(kd_, (B, 4), jnp.float32)

    params = init_params(kp_)
    kparams = prepare_params(params)

    fwd = jax.jit(fc_snake_forward)
    out = jax.block_until_ready(fwd(boards, directions, kparams))
    assert out.shape == (B, 4)

    # Bit-level mirror of the kernel math (same bf16 casts): tight tolerance.
    ref = _reference_forward(boards, directions, kparams)
    assert jnp.allclose(out, ref, atol=2e-3, rtol=2e-3), \
        float(jnp.max(jnp.abs(out - ref)))

    # Full-f32 module semantics: loose tolerance for the bf16 MXU path.
    ref32 = _reference_forward_f32(boards, directions, params)
    assert jnp.allclose(out, ref32, atol=0.15, rtol=0.15), \
        float(jnp.max(jnp.abs(out - ref32)))

    print("KERNEL_OK")
</pallas_src>

<mosaic_0001>
module attributes {stable_mosaic.version = 11 : i64} {
  func.func @_layer1_kernel(%arg0: i32, %arg1: memref<8x784xf32, #tpu.memory_space<vmem>>, %arg2: memref<8x4xf32, #tpu.memory_space<vmem>>, %arg3: memref<784x128xbf16, #tpu.memory_space<vmem>>, %arg4: memref<4x128xbf16, #tpu.memory_space<vmem>>, %arg5: memref<1x128xf32, #tpu.memory_space<vmem>>, %arg6: memref<8x128xbf16, #tpu.memory_space<vmem>>, %arg7: memref<1x2x128xf32, #tpu.memory_space<vmem>>) attributes {dimension_semantics = [#tpu.dimension_semantics<parallel>], iteration_bounds = array<i64: 1>, scalar_prefetch = 0 : i64, scratch_operands = 0 : i64, tpu.core_type = #tpu.core_type<tc>, window_params = [{transform_indices = @transform_0, window_bounds = array<i64: 8, 784>}, {transform_indices = @transform_1, window_bounds = array<i64: 8, 4>}, {pipeline_mode = #tpu.pipeline_mode<synchronous>, transform_indices = @transform_2, window_bounds = array<i64: 784, 128>}, {pipeline_mode = #tpu.pipeline_mode<synchronous>, transform_indices = @transform_3, window_bounds = array<i64: 4, 128>}, {pipeline_mode = #tpu.pipeline_mode<synchronous>, transform_indices = @transform_4, window_bounds = array<i64: 1, 128>}, {transform_indices = @transform_5, window_bounds = array<i64: 8, 128>}, {transform_indices = @transform_6, window_bounds = array<i64: 1, 2, 128>}]} {
    %c0 = arith.constant 0 : index
    %c0_0 = arith.constant 0 : index
    %0 = vector.load %arg1[%c0, %c0_0] : memref<8x784xf32, #tpu.memory_space<vmem>>, vector<8x784xf32>
    %1 = arith.truncf %0 : vector<8x784xf32> to vector<8x784xbf16>
    %c0_1 = arith.constant 0 : index
    %c0_2 = arith.constant 0 : index
    %2 = vector.load %arg2[%c0_1, %c0_2] : memref<8x4xf32, #tpu.memory_space<vmem>>, vector<8x4xf32>
    %3 = arith.truncf %2 : vector<8x4xf32> to vector<8x4xbf16>
    %c0_3 = arith.constant 0 : index
    %c0_4 = arith.constant 0 : index
    %4 = vector.load %arg3[%c0_3, %c0_4] : memref<784x128xbf16, #tpu.memory_space<vmem>>, vector<784x128xbf16>
    %cst = arith.constant dense<0.000000e+00> : vector<8x128xf32>
    %5 = tpu.matmul %1, %4, %cst {dimension_numbers = #tpu.dot_dimension_numbers<[1], [0], [0], [1], [0, 0, 1, 1], [], []>} : vector<8x784xbf16>, vector<784x128xbf16>, vector<8x128xf32> -> vector<8x128xf32>
    %c0_5 = arith.constant 0 : index
    %c0_6 = arith.constant 0 : index
    %6 = vector.load %arg4[%c0_5, %c0_6] : memref<4x128xbf16, #tpu.memory_space<vmem>>, vector<4x128xbf16>
    %cst_7 = arith.constant dense<0.000000e+00> : vector<8x128xf32>
    %7 = tpu.matmul %3, %6, %cst_7 {dimension_numbers = #tpu.dot_dimension_numbers<[1], [0], [0], [1], [0, 0, 1, 1], [], []>} : vector<8x4xbf16>, vector<4x128xbf16>, vector<8x128xf32> -> vector<8x128xf32>
    %8 = arith.addf %5, %7 : vector<8x128xf32>
    %c0_8 = arith.constant 0 : index
    %c0_9 = arith.constant 0 : index
    %9 = vector.load %arg5[%c0_8, %c0_9] : memref<1x128xf32, #tpu.memory_space<vmem>>, vector<1x128xf32>
    %10 = vector.broadcast %9 : vector<1x128xf32> to vector<8x128xf32>
    %11 = arith.addf %8, %10 : vector<8x128xf32>
    %cst_10 = arith.constant 0.000000e+00 : f32
    %12 = vector.broadcast %cst_10 : f32 to vector<8x128xf32>
    %13 = arith.maximumf %11, %12 : vector<8x128xf32>
    %cst_11 = arith.constant dense<0.000000e+00> : vector<128xf32>
    %14 = vector.multi_reduction <add>, %13, %cst_11 [0] : vector<8x128xf32> to vector<128xf32>
    %15 = vector.shape_cast %14 : vector<128xf32> to vector<1x128xf32>
    %16 = arith.mulf %13, %13 : vector<8x128xf32>
    %cst_12 = arith.constant dense<0.000000e+00> : vector<128xf32>
    %17 = vector.multi_reduction <add>, %16, %cst_12 [0] : vector<8x128xf32> to vector<128xf32>
    %18 = vector.shape_cast %17 : vector<128xf32> to vector<1x128xf32>
    %19 = tpu.concatenate %15, %18 in 0 : vector<1x128xf32>, vector<1x128xf32> -> vector<2x128xf32>
    %c0_13 = arith.constant 0 : index
    %c0_14 = arith.constant 0 : index
    %c0_15 = arith.constant 0 : index
    %20 = vector.load %arg7[%c0_13, %c0_14, %c0_15] : memref<1x2x128xf32, #tpu.memory_space<vmem>>, vector<1x2x128xf32>
    %21 = vector.shape_cast %20 : vector<1x2x128xf32> to vector<2x128xf32>
    %22 = vector.shape_cast %19 : vector<2x128xf32> to vector<1x2x128xf32>
    tpu.vector_store %arg7[%c0_13, %c0_14, %c0_15], %22 {strides = array<i32>} : memref<1x2x128xf32, #tpu.memory_space<vmem>>, vector<1x2x128xf32>,
    %23 = arith.truncf %13 : vector<8x128xf32> to vector<8x128xbf16>
    %c0_16 = arith.constant 0 : index
    %c0_17 = arith.constant 0 : index
    %24 = vector.load %arg6[%c0_16, %c0_17] : memref<8x128xbf16, #tpu.memory_space<vmem>>, vector<8x128xbf16>
    tpu.vector_store %arg6[%c0_16, %c0_17], %23 {strides = array<i32>} : memref<8x128xbf16, #tpu.memory_space<vmem>>, vector<8x128xbf16>,
    return
  }
  func.func @transform_0(%arg0: i32) -> (i32, i32) {
    %c0_i32 = arith.constant 0 : i32
    %c0_i32_0 = arith.constant 0 : i32
    return %arg0, %c0_i32 : i32, i32
  }
  func.func @transform_1(%arg0: i32) -> (i32, i32) {
    %c0_i32 = arith.constant 0 : i32
    %c0_i32_0 = arith.constant 0 : i32
    return %arg0, %c0_i32 : i32, i32
  }
  func.func @transform_2(%arg0: i32) -> (i32, i32) {
    %c0_i32 = arith.constant 0 : i32
    %c0_i32_0 = arith.constant 0 : i32
    %c0_i32_1 = arith.constant 0 : i32
    return %c0_i32, %c0_i32_0 : i32, i32
  }
  func.func @transform_3(%arg0: i32) -> (i32, i32) {
    %c0_i32 = arith.constant 0 : i32
    %c0_i32_0 = arith.constant 0 : i32
    %c0_i32_1 = arith.constant 0 : i32
    return %c0_i32, %c0_i32_0 : i32, i32
  }
  func.func @transform_4(%arg0: i32) -> (i32, i32) {
    %c0_i32 = arith.constant 0 : i32
    %c0_i32_0 = arith.constant 0 : i32
    %c0_i32_1 = arith.constant 0 : i32
    return %c0_i32, %c0_i32_0 : i32, i32
  }
  func.func @transform_5(%arg0: i32) -> (i32, i32) {
    %c0_i32 = arith.constant 0 : i32
    %c0_i32_0 = arith.constant 0 : i32
    return %arg0, %c0_i32 : i32, i32
  }
  func.func @transform_6(%arg0: i32) -> (i32, i32, i32) {
    %c0_i32 = arith.constant 0 : i32
    %c0_i32_0 = arith.constant 0 : i32
    %c0_i32_1 = arith.constant 0 : i32
    return %arg0, %c0_i32, %c0_i32_0 : i32, i32, i32
  }
}

module attributes {stable_mosaic.version = 11 : i64} {
  func.func @_layer3_kernel(%arg0: i32, %arg1: memref<8x128xbf16, #tpu.memory_space<vmem>>, %arg2: memref<1x128xf32, #tpu.memory_space<vmem>>, %arg3: memref<1x128xf32, #tpu.memory_space<vmem>>, %arg4: memref<128x128xbf16, #tpu.memory_space<vmem>>, %arg5: memref<1x128xf32, #tpu.memory_space<vmem>>, %arg6: memref<8x128xf32, #tpu.memory_space<vmem>>) attributes {dimension_semantics = [#tpu.dimension_semantics<parallel>], iteration_bounds = array<i64: 1>, scalar_prefetch = 0 : i64, scratch_operands = 0 : i64, tpu.core_type = #tpu.core_type<tc>, window_params = [{transform_indices = @transform_0, window_bounds = array<i64: 8, 128>}, {pipeline_mode = #tpu.pipeline_mode<synchronous>, transform_indices = @transform_1, window_bounds = array<i64: 1, 128>}, {pipeline_mode = #tpu.pipeline_mode<synchronous>, transform_indices = @transform_2, window_bounds = array<i64: 1, 128>}, {pipeline_mode = #tpu.pipeline_mode<synchronous>, transform_indices = @transform_3, window_bounds = array<i64: 128, 128>}, {pipeline_mode = #tpu.pipeline_mode<synchronous>, transform_indices = @transform_4, window_bounds = array<i64: 1, 128>}, {transform_indices = @transform_5, window_bounds = array<i64: 8, 128>}]} {
    %c0 = arith.constant 0 : index
    %c0_0 = arith.constant 0 : index
    %0 = vector.load %arg1[%c0, %c0_0] : memref<8x128xbf16, #tpu.memory_space<vmem>>, vector<8x128xbf16>
    %1 = arith.extf %0 : vector<8x128xbf16> to vector<8x128xf32>
    %c0_1 = arith.constant 0 : index
    %c0_2 = arith.constant 0 : index
    %2 = vector.load %arg2[%c0_1, %c0_2] : memref<1x128xf32, #tpu.memory_space<vmem>>, vector<1x128xf32>
    %3 = vector.broadcast %2 : vector<1x128xf32> to vector<8x128xf32>
    %4 = arith.mulf %1, %3 : vector<8x128xf32>
    %c0_3 = arith.constant 0 : index
    %c0_4 = arith.constant 0 : index
    %5 = vector.load %arg3[%c0_3, %c0_4] : memref<1x128xf32, #tpu.memory_space<vmem>>, vector<1x128xf32>
    %6 = vector.broadcast %5 : vector<1x128xf32> to vector<8x128xf32>
    %7 = arith.addf %4, %6 : vector<8x128xf32>
    %8 = arith.truncf %7 : vector<8x128xf32> to vector<8x128xbf16>
    %c0_5 = arith.constant 0 : index
    %c0_6 = arith.constant 0 : index
    %9 = vector.load %arg4[%c0_5, %c0_6] : memref<128x128xbf16, #tpu.memory_space<vmem>>, vector<128x128xbf16>
    %cst = arith.constant dense<0.000000e+00> : vector<8x128xf32>
    %10 = tpu.matmul %8, %9, %cst {dimension_numbers = #tpu.dot_dimension_numbers<[1], [0], [0], [1], [0, 0, 1, 1], [], []>} : vector<8x128xbf16>, vector<128x128xbf16>, vector<8x128xf32> -> vector<8x128xf32>
    %c0_7 = arith.constant 0 : index
    %c0_8 = arith.constant 0 : index
    %11 = vector.load %arg5[%c0_7, %c0_8] : memref<1x128xf32, #tpu.memory_space<vmem>>, vector<1x128xf32>
    %12 = vector.broadcast %11 : vector<1x128xf32> to vector<8x128xf32>
    %13 = arith.addf %10, %12 : vector<8x128xf32>
    %c0_9 = arith.constant 0 : index
    %c0_10 = arith.constant 0 : index
    %14 = vector.load %arg6[%c0_9, %c0_10] : memref<8x128xf32, #tpu.memory_space<vmem>>, vector<8x128xf32>
    tpu.vector_store %arg6[%c0_9, %c0_10], %13 {strides = array<i32>} : memref<8x128xf32, #tpu.memory_space<vmem>>, vector<8x128xf32>,
    return
  }
  func.func @transform_0(%arg0: i32) -> (i32, i32) {
    %c0_i32 = arith.constant 0 : i32
    %c0_i32_0 = arith.constant 0 : i32
    return %arg0, %c0_i32 : i32, i32
  }
  func.func @transform_1(%arg0: i32) -> (i32, i32) {
    %c0_i32 = arith.constant 0 : i32
    %c0_i32_0 = arith.constant 0 : i32
    %c0_i32_1 = arith.constant 0 : i32
    return %c0_i32, %c0_i32_0 : i32, i32
  }
  func.func @transform_2(%arg0: i32) -> (i32, i32) {
    %c0_i32 = arith.constant 0 : i32
    %c0_i32_0 = arith.constant 0 : i32
    %c0_i32_1 = arith.constant 0 : i32
    return %c0_i32, %c0_i32_0 : i32, i32
  }
  func.func @transform_3(%arg0: i32) -> (i32, i32) {
    %c0_i32 = arith.constant 0 : i32
    %c0_i32_0 = arith.constant 0 : i32
    %c0_i32_1 = arith.constant 0 : i32
    return %c0_i32, %c0_i32_0 : i32, i32
  }
  func.func @transform_4(%arg0: i32) -> (i32, i32) {
    %c0_i32 = arith.constant 0 : i32
    %c0_i32_0 = arith.constant 0 : i32
    %c0_i32_1 = arith.constant 0 : i32
    return %c0_i32, %c0_i32_0 : i32, i32
  }
  func.func @transform_5(%arg0: i32) -> (i32, i32) {
    %c0_i32 = arith.constant 0 : i32
    %c0_i32_0 = arith.constant 0 : i32
    return %arg0, %c0_i32 : i32, i32
  }
}

module attributes {stable_mosaic.version = 11 : i64} {
  func.func @_layer2_kernel(%arg0: i32, %arg1: memref<8x128xbf16, #tpu.memory_space<vmem>>, %arg2: memref<1x128xf32, #tpu.memory_space<vmem>>, %arg3: memref<1x128xf32, #tpu.memory_space<vmem>>, %arg4: memref<128x128xbf16, #tpu.memory_space<vmem>>, %arg5: memref<1x128xf32, #tpu.memory_space<vmem>>, %arg6: memref<8x128xbf16, #tpu.memory_space<vmem>>, %arg7: memref<1x2x128xf32, #tpu.memory_space<vmem>>) attributes {dimension_semantics = [#tpu.dimension_semantics<parallel>], iteration_bounds = array<i64: 1>, scalar_prefetch = 0 : i64, scratch_operands = 0 : i64, tpu.core_type = #tpu.core_type<tc>, window_params = [{transform_indices = @transform_0, window_bounds = array<i64: 8, 128>}, {pipeline_mode = #tpu.pipeline_mode<synchronous>, transform_indices = @transform_1, window_bounds = array<i64: 1, 128>}, {pipeline_mode = #tpu.pipeline_mode<synchronous>, transform_indices = @transform_2, window_bounds = array<i64: 1, 128>}, {pipeline_mode = #tpu.pipeline_mode<synchronous>, transform_indices = @transform_3, window_bounds = array<i64: 128, 128>}, {pipeline_mode = #tpu.pipeline_mode<synchronous>, transform_indices = @transform_4, window_bounds = array<i64: 1, 128>}, {transform_indices = @transform_5, window_bounds = array<i64: 8, 128>}, {transform_indices = @transform_6, window_bounds = array<i64: 1, 2, 128>}]} {
    %c0 = arith.constant 0 : index
    %c0_0 = arith.constant 0 : index
    %0 = vector.load %arg1[%c0, %c0_0] : memref<8x128xbf16, #tpu.memory_space<vmem>>, vector<8x128xbf16>
    %1 = arith.extf %0 : vector<8x128xbf16> to vector<8x128xf32>
    %c0_1 = arith.constant 0 : index
    %c0_2 = arith.constant 0 : index
    %2 = vector.load %arg2[%c0_1, %c0_2] : memref<1x128xf32, #tpu.memory_space<vmem>>, vector<1x128xf32>
    %3 = vector.broadcast %2 : vector<1x128xf32> to vector<8x128xf32>
    %4 = arith.mulf %1, %3 : vector<8x128xf32>
    %c0_3 = arith.constant 0 : index
    %c0_4 = arith.constant 0 : index
    %5 = vector.load %arg3[%c0_3, %c0_4] : memref<1x128xf32, #tpu.memory_space<vmem>>, vector<1x128xf32>
    %6 = vector.broadcast %5 : vector<1x128xf32> to vector<8x128xf32>
    %7 = arith.addf %4, %6 : vector<8x128xf32>
    %8 = arith.truncf %7 : vector<8x128xf32> to vector<8x128xbf16>
    %c0_5 = arith.constant 0 : index
    %c0_6 = arith.constant 0 : index
    %9 = vector.load %arg4[%c0_5, %c0_6] : memref<128x128xbf16, #tpu.memory_space<vmem>>, vector<128x128xbf16>
    %cst = arith.constant dense<0.000000e+00> : vector<8x128xf32>
    %10 = tpu.matmul %8, %9, %cst {dimension_numbers = #tpu.dot_dimension_numbers<[1], [0], [0], [1], [0, 0, 1, 1], [], []>} : vector<8x128xbf16>, vector<128x128xbf16>, vector<8x128xf32> -> vector<8x128xf32>
    %c0_7 = arith.constant 0 : index
    %c0_8 = arith.constant 0 : index
    %11 = vector.load %arg5[%c0_7, %c0_8] : memref<1x128xf32, #tpu.memory_space<vmem>>, vector<1x128xf32>
    %12 = vector.broadcast %11 : vector<1x128xf32> to vector<8x128xf32>
    %13 = arith.addf %10, %12 : vector<8x128xf32>
    %cst_9 = arith.constant 0.000000e+00 : f32
    %14 = vector.broadcast %cst_9 : f32 to vector<8x128xf32>
    %15 = arith.maximumf %13, %14 : vector<8x128xf32>
    %cst_10 = arith.constant dense<0.000000e+00> : vector<128xf32>
    %16 = vector.multi_reduction <add>, %15, %cst_10 [0] : vector<8x128xf32> to vector<128xf32>
    %17 = vector.shape_cast %16 : vector<128xf32> to vector<1x128xf32>
    %18 = arith.mulf %15, %15 : vector<8x128xf32>
    %cst_11 = arith.constant dense<0.000000e+00> : vector<128xf32>
    %19 = vector.multi_reduction <add>, %18, %cst_11 [0] : vector<8x128xf32> to vector<128xf32>
    %20 = vector.shape_cast %19 : vector<128xf32> to vector<1x128xf32>
    %21 = tpu.concatenate %17, %20 in 0 : vector<1x128xf32>, vector<1x128xf32> -> vector<2x128xf32>
    %c0_12 = arith.constant 0 : index
    %c0_13 = arith.constant 0 : index
    %c0_14 = arith.constant 0 : index
    %22 = vector.load %arg7[%c0_12, %c0_13, %c0_14] : memref<1x2x128xf32, #tpu.memory_space<vmem>>, vector<1x2x128xf32>
    %23 = vector.shape_cast %22 : vector<1x2x128xf32> to vector<2x128xf32>
    %24 = vector.shape_cast %21 : vector<2x128xf32> to vector<1x2x128xf32>
    tpu.vector_store %arg7[%c0_12, %c0_13, %c0_14], %24 {strides = array<i32>} : memref<1x2x128xf32, #tpu.memory_space<vmem>>, vector<1x2x128xf32>,
    %25 = arith.truncf %15 : vector<8x128xf32> to vector<8x128xbf16>
    %c0_15 = arith.constant 0 : index
    %c0_16 = arith.constant 0 : index
    %26 = vector.load %arg6[%c0_15, %c0_16] : memref<8x128xbf16, #tpu.memory_space<vmem>>, vector<8x128xbf16>
    tpu.vector_store %arg6[%c0_15, %c0_16], %25 {strides = array<i32>} : memref<8x128xbf16, #tpu.memory_space<vmem>>, vector<8x128xbf16>,
    return
  }
  func.func @transform_0(%arg0: i32) -> (i32, i32) {
    %c0_i32 = arith.constant 0 : i32
    %c0_i32_0 = arith.constant 0 : i32
    return %arg0, %c0_i32 : i32, i32
  }
  func.func @transform_1(%arg0: i32) -> (i32, i32) {
    %c0_i32 = arith.constant 0 : i32
    %c0_i32_0 = arith.constant 0 : i32
    %c0_i32_1 = arith.constant 0 : i32
    return %c0_i32, %c0_i32_0 : i32, i32
  }
  func.func @transform_2(%arg0: i32) -> (i32, i32) {
    %c0_i32 = arith.constant 0 : i32
    %c0_i32_0 = arith.constant 0 : i32
    %c0_i32_1 = arith.constant 0 : i32
    return %c0_i32, %c0_i32_0 : i32, i32
  }
  func.func @transform_3(%arg0: i32) -> (i32, i32) {
    %c0_i32 = arith.constant 0 : i32
    %c0_i32_0 = arith.constant 0 : i32
    %c0_i32_1 = arith.constant 0 : i32
    return %c0_i32, %c0_i32_0 : i32, i32
  }
  func.func @transform_4(%arg0: i32) -> (i32, i32) {
    %c0_i32 = arith.constant 0 : i32
    %c0_i32_0 = arith.constant 0 : i32
    %c0_i32_1 = arith.constant 0 : i32
    return %c0_i32, %c0_i32_0 : i32, i32
  }
  func.func @transform_5(%arg0: i32) -> (i32, i32) {
    %c0_i32 = arith.constant 0 : i32
    %c0_i32_0 = arith.constant 0 : i32
    return %arg0, %c0_i32 : i32, i32
  }
  func.func @transform_6(%arg0: i32) -> (i32, i32, i32) {
    %c0_i32 = arith.constant 0 : i32
    %c0_i32_0 = arith.constant 0 : i32
    %c0_i32_1 = arith.constant 0 : i32
    return %arg0, %c0_i32, %c0_i32_0 : i32, i32, i32
  }
}

</mosaic_0001>

<bundles_post_ra>
// kernel: fc_snake_forward.5
= control target key start
LH: loop header
LB: loop body
LE: loop exit
PB: predicated region body
PF: predicated region fallthrough
CT: control target
= control target key end

     0   :  { %s231_s3 = inlined_call_operand.vmem [shape: bf16[128,128], index: 3, kind: input, shape index: {}]   ;;  %s232_s1 = inlined_call_operand.vmem [shape: f32[1,128], index: 1, kind: input, shape index: {}]   ;;  %s233_s2 = inlined_call_operand.vmem [shape: f32[1,128], index: 2, kind: input, shape index: {}]   ;;  %s234_s4 = inlined_call_operand.vmem [shape: f32[1,128], index: 4, kind: input, shape index: {}]   ;;  %s235_s0 = inlined_call_operand.vmem [shape: bf16[8,128], index: 0, kind: input, shape index: {}]   ;;  %s236_s5 = inlined_call_operand.vmem [shape: f32[8,128], index: 5, kind: output, shape index: {}]  }
   0x1   :  { %v158_v0 = vld [vmem:[%s231_s3 + $0x38] sm:$0xff]  ;;  %v157_v1 = vld [vmem:[%s231_s3 + $0x30] sm:$0xff]  ;;  %v156_v2 = vld [vmem:[%s231_s3 + $0x28] sm:$0xff] }
   0x2   :  { %101 = vmatpush.bf16.msra.mxu0 %v158_v0  ;;  %v155_v3 = vld [vmem:[%s231_s3 + $0x20] sm:$0xff]  ;;  %v154_v4 = vld [vmem:[%s231_s3 + $0x18] sm:$0xff]  ;;  %v153_v8 = vld [vmem:[%s231_s3 + $0x10] sm:$0xff] }
   0x3   :  { %v20_v5 = vld [vmem:[%s235_s0] sm:$0xf]  ;;  %v152_v11 = vld [vmem:[%s231_s3 + $0x8] sm:$0xff] }
   0x4   :  { %v21_v6 = vunpack.c.l.bf16 %v20_v5  ;;  %v159_v7 = vld [vmem:[%s232_s1] ss:$0 sm:$0xff] }
   0x5   :  { %v160_v10 = vld [vmem:[%s233_s2] ss:$0 sm:$0xff] }
   0x6   :  { %102 = vmatpush.bf16.msra.mxu0 %v157_v1  ;;  %v26_v9 = vmul.f32 %v159_v7, %v21_v6  ;;  %v151_v13 = vld [vmem:[%s231_s3] sm:$0xff] }
   0x7   :  { %v161_v15 = vld [vmem:[%s234_s4] ss:$0 sm:$0xff] }
   0x8   :  { %v31_v12 = vadd.f32 %v160_v10, %v26_v9 }
   0xa   :  { %103 = vmatpush.bf16.msra.mxu0 %v156_v2  ;;  %v32_v14 = vpack.c.bf16 %v31_v12, %v31_v12 }
   0xe   :  { %104 = vmatpush.bf16.msra.mxu0 %v155_v3 }
  0x12   :  { %105 = vmatpush.bf16.msra.mxu0 %v154_v4 }
  0x16   :  { %106 = vmatpush.bf16.msra.mxu0 %v153_v8 }
  0x1a   :  { %107 = vmatpush.bf16.msra.mxu0 %v152_v11 }
  0x1e   :  { %108 = vmatpush.bf16.msra.mxu0 %v151_v13 }
  0x21   :  { %109 = vmatmul.bf16.vlgmr.msra.gmra.mxu0 %v32_v14 }
  0x9e   :  { %v110_v16 = vpop.f32.mrf.mxu0 }
  0x9f   :  { %v111_v17 = vadd.f32 %v161_v15, %v110_v16 }
  0xa1   :  { %114 = vst [vmem:[%s236_s5] sm:$0xff] %v111_v17 }
  0xa6   :  { %v112_v18 = vpop.f32.mrf.mxu0 }

// kernel: fc_snake_forward.4
= control target key start
LH: loop header
LB: loop body
LE: loop exit
PB: predicated region body
PF: predicated region fallthrough
CT: control target
= control target key end

     0   :  { %vm130_vm0 = vcmask 1040384   ;;  %s263_s3 = inlined_call_operand.vmem [shape: bf16[128,128], index: 3, kind: input, shape index: {}]   ;;  %s264_s1 = inlined_call_operand.vmem [shape: f32[1,128], index: 1, kind: input, shape index: {}]   ;;  %s265_s2 = inlined_call_operand.vmem [shape: f32[1,128], index: 2, kind: input, shape index: {}]   ;;  %s266_s4 = inlined_call_operand.vmem [shape: f32[1,128], index: 4, kind: input, shape index: {}]   ;;  %s267_s0 = inlined_call_operand.vmem [shape: bf16[8,128], index: 0, kind: input, shape index: {}]   ;;  %s268_s5 = inlined_call_operand.vmem [shape: bf16[8,128], index: 5, kind: output, shape index: {0}]   ;;  %s269_s6 = inlined_call_operand.vmem [shape: f32[1,2,128], index: 6, kind: output, shape index: {1}]  }
   0x1   :  { %v182_v0 = vld [vmem:[%s263_s3 + $0x38] sm:$0xff]  ;;  %v181_v1 = vld [vmem:[%s263_s3 + $0x30] sm:$0xff]  ;;  %v180_v2 = vld [vmem:[%s263_s3 + $0x28] sm:$0xff] }
   0x2   :  { %103 = vmatpush.bf16.msra.mxu0 %v182_v0  ;;  %v179_v3 = vld [vmem:[%s263_s3 + $0x20] sm:$0xff]  ;;  %v178_v4 = vld [vmem:[%s263_s3 + $0x18] sm:$0xff]  ;;  %v177_v8 = vld [vmem:[%s263_s3 + $0x10] sm:$0xff] }
   0x3   :  { %v22_v5 = vld [vmem:[%s267_s0] sm:$0xf]  ;;  %v176_v11 = vld [vmem:[%s263_s3 + $0x8] sm:$0xff] }
   0x4   :  { %v23_v6 = vunpack.c.l.bf16 %v22_v5  ;;  %v183_v7 = vld [vmem:[%s264_s1] ss:$0 sm:$0xff] }
   0x5   :  { %v184_v10 = vld [vmem:[%s265_s2] ss:$0 sm:$0xff] }
   0x6   :  { %104 = vmatpush.bf16.msra.mxu0 %v181_v1  ;;  %v28_v9 = vmul.f32 %v183_v7, %v23_v6  ;;  %v175_v13 = vld [vmem:[%s263_s3] sm:$0xff] }
   0x7   :  { %v185_v15 = vld [vmem:[%s266_s4] ss:$0 sm:$0xff] }
   0x8   :  { %v33_v12 = vadd.f32 %v184_v10, %v28_v9 }
   0xa   :  { %105 = vmatpush.bf16.msra.mxu0 %v180_v2  ;;  %v34_v14 = vpack.c.bf16 %v33_v12, %v33_v12 }
   0xe   :  { %106 = vmatpush.bf16.msra.mxu0 %v179_v3 }
  0x12   :  { %107 = vmatpush.bf16.msra.mxu0 %v178_v4 }
  0x16   :  { %108 = vmatpush.bf16.msra.mxu0 %v177_v8 }
  0x1a   :  { %109 = vmatpush.bf16.msra.mxu0 %v176_v11 }
  0x1e   :  { %110 = vmatpush.bf16.msra.mxu0 %v175_v13 }
  0x21   :  { %111 = vmatmul.bf16.vlgmr.msra.gmra.mxu0 %v34_v14 }
  0x9e   :  { %v112_v16 = vpop.f32.mrf.mxu0 }
  0x9f   :  { %v113_v17 = vadd.f32 %v185_v15, %v112_v16 }
  0xa1   :  { %v116_v18 = vmax.f32 %v113_v17, 0.0 }
  0xa3   :  { %v117_v19 = vrot.slane %v116_v18, 4  ;;  %v123_v20 = vmul.f32 %v116_v18, %v116_v18  ;;  %v133_v21 = vpack.c.bf16 %v116_v18, %v116_v18 }
  0xa5   :  { %v118_v22 = vadd.f32 %v117_v19, %v116_v18  ;;  %v124_v23 = vrot.slane %v123_v20, 4  ;;  %134 = vst [vmem:[%s268_s5] sm:$0xf] %v133_v21 }
  0xa6   :  { %v114_v24 = vpop.f32.mrf.mxu0 }
  0xa7   :  { %v119_v25 = vrot.slane %v118_v22, 2  ;;  %v125_v26 = vadd.f32 %v124_v23, %v123_v20 }
  0xa9   :  { %v120_v27 = vadd.f32 %v119_v25, %v118_v22  ;;  %v126_v28 = vrot.slane %v125_v26, 2 }
  0xab   :  { %v121_v29 = vrot.slane %v120_v27, 1  ;;  %v127_v30 = vadd.f32 %v126_v28, %v125_v26 }
  0xad   :  { %v128_v31 = vrot.slane %v127_v30, 1  ;;  %v122_v32 = vadd.f32 %v121_v29, %v120_v27 }
  0xaf   :  { %v129_v33 = vadd.f32 %v128_v31, %v127_v30 }
  0xb1   :  { %v131_v34 = vsel %vm130_vm0, %v122_v32, %v129_v33 }
  0xb2   :  { %132 = vst [vmem:[%s269_s6] sm:$0x3] %v131_v34 }

// kernel: fc_snake_forward.3
= control target key start
LH: loop header
LB: loop body
LE: loop exit
PB: predicated region body
PF: predicated region fallthrough
CT: control target
= control target key end

     0   :  { %vm142_vm0 = vcmask 1041408   ;;  %vm138_vm1 = vcmask 31744   ;;  %vm453_vm2 = vcmask 130048   ;;  %vm567_vm3 = vcmask 1040384   ;;  %s1046_s2 = inlined_call_operand.vmem [shape: bf16[784,128], index: 2, kind: input, shape index: {}]   ;;  %s1047_s3 = inlined_call_operand.vmem [shape: bf16[4,128], index: 3, kind: input, shape index: {}]   ;;  %s1048_s1 = inlined_call_operand.vmem [shape: f32[8,4], index: 1, kind: input, shape index: {}]   ;;  %s1049_s0 = inlined_call_operand.vmem [shape: f32[8,784], index: 0, kind: input, shape index: {}]   ;;  %s1050_s4 = inlined_call_operand.vmem [shape: f32[1,128], index: 4, kind: input, shape index: {}]   ;;  %s1051_s5 = inlined_call_operand.vmem [shape: bf16[8,128], index: 5, kind: output, shape index: {0}]   ;;  %s1052_s6 = inlined_call_operand.vmem [shape: f32[1,2,128], index: 6, kind: output, shape index: {1}]  }
   0x1   :  { %v785_v0 = vld [vmem:[%s1046_s2 + $0x38] sm:$0xff]  ;;  %v784_v3 = vld [vmem:[%s1046_s2 + $0x30] sm:$0xff]  ;;  %v137_v6 = vld [vmem:[%s1047_s3] sm:$0x3] }
   0x2   :  { %v793_v1 = vld [vmem:[%s1046_s2 + $0x78] sm:$0xff]  ;;  %457 = vmatpush.bf16.msra.mxu1 %v785_v0  ;;  %v792_v4 = vld [vmem:[%s1046_s2 + $0x70] sm:$0xff]  ;;  %v144_v7 = vsel %vm142_vm0, %v137_v6, 0  ;;  %v783_v9 = vld [vmem:[%s1046_s2 + $0x28] sm:$0xff] }
   0x3   :  { %v801_v2 = vld [vmem:[%s1046_s2 + $0xb8] sm:$0xff]  ;;  %470 = vmatpush.bf16.msra.mxu2 %v793_v1  ;;  %v800_v5 = vld [vmem:[%s1046_s2 + $0xb0] sm:$0xff]  ;;  %v791_v10 = vld [vmem:[%s1046_s2 + $0x68] sm:$0xff]  ;;  %153 = vmatpush.bf16.msra.mxu0 %v144_v7 }
   0x4   :  { %483 = vmatpush.bf16.msra.mxu3 %v801_v2  ;;  %v809_v8 = vld [vmem:[%s1046_s2 + $0xf8] sm:$0xff]  ;;  %v799_v11 = vld [vmem:[%s1046_s2 + $0xa8] sm:$0xff]  ;;  %v808_v12 = vld [vmem:[%s1046_s2 + $0xf0] sm:$0xff] }
   0x5   :  { %v782_v13 = vld [vmem:[%s1046_s2 + $0x20] sm:$0xff]  ;;  %v807_v17 = vld [vmem:[%s1046_s2 + $0xe8] sm:$0xff]  ;;  %v781_v19 = vld [vmem:[%s1046_s2 + $0x18] sm:$0xff] }
   0x6   :  { %458 = vmatpush.bf16.msra.mxu1 %v784_v3  ;;  %v790_v14 = vld [vmem:[%s1046_s2 + $0x60] sm:$0xff]  ;;  %v789_v20 = vld [vmem:[%s1046_s2 + $0x58] sm:$0xff]  ;;  %v780_v23 = vld [vmem:[%s1046_s2 + $0x10] sm:$0xff] }
   0x7   :  { %471 = vmatpush.bf16.msra.mxu2 %v792_v4  ;;  %496 = vmatpush.bf16.msrb.mxu0 %v809_v8  ;;  %v798_v15 = vld [vmem:[%s1046_s2 + $0xa0] sm:$0xff]  ;;  %v797_v21 = vld [vmem:[%s1046_s2 + $0x98] sm:$0xff]  ;;  %v788_v24 = vld [vmem:[%s1046_s2 + $0x50] sm:$0xff] }
   0x8   :  { %484 = vmatpush.bf16.msra.mxu3 %v800_v5  ;;  %v37_v16 = vld [vmem:[%s1048_s1] sm:$0xff]  ;;  %v796_v25 = vld [vmem:[%s1046_s2 + $0x90] sm:$0xff]  ;;  %v805_v26 = vld [vmem:[%s1046_s2 + $0xd8] sm:$0xff] }
   0x9   :  { %v38_v18 = vpack.c.bf16 %v37_v16, %v37_v16  ;;  %v806_v22 = vld [vmem:[%s1046_s2 + $0xe0] sm:$0xff]  ;;  %v779_v27 = vld [vmem:[%s1046_s2 + $0x8] sm:$0xff]  ;;  %v804_v30 = vld [vmem:[%s1046_s2 + $0xd0] sm:$0xff] }
   0xa   :  { %459 = vmatpush.bf16.msra.mxu1 %v783_v9  ;;  %v787_v28 = vld [vmem:[%s1046_s2 + $0x48] sm:$0xff]  ;;  %v778_v31 = vld [vmem:[%s1046_s2] sm:$0xff]  ;;  %v817_v35 = vld [vmem:[%s1046_s2 + $0x138] sm:$0xff] }
   0xb   :  { %472 = vmatpush.bf16.msra.mxu2 %v791_v10  ;;  %497 = vmatpush.bf16.msrb.mxu0 %v808_v12  ;;  %v795_v29 = vld [vmem:[%s1046_s2 + $0x88] sm:$0xff]  ;;  %v786_v32 = vld [vmem:[%s1046_s2 + $0x40] sm:$0xff]  ;;  %v825_v36 = vld [vmem:[%s1046_s2 + $0x178] sm:$0xff] }
   0xc   :  { %485 = vmatpush.bf16.msra.mxu3 %v799_v11  ;;  %580 = vmatmul.msk.bf16.vlgmr.msra.gmra.mxu0 %vm138_vm1, %v38_v18  ;;  %v24_v33 = vld [vmem:[%s1049_s0 + $0x8] sm:$0xff]  ;;  %v23_v34 = vld [vmem:[%s1049_s0] sm:$0xff]  ;;  %v25_v40 = vld [vmem:[%s1049_s0 + $0x10] sm:$0xff] }
   0xd   :  { %v794_v37 = vld [vmem:[%s1046_s2 + $0x80] sm:$0xff]  ;;  %v803_v38 = vld [vmem:[%s1046_s2 + $0xc8] sm:$0xff]  ;;  %v31_v39 = vpack.c.bf16 %v24_v33, %v24_v33  ;;  %v30_v41 = vpack.c.bf16 %v23_v34, %v23_v34  ;;  %v816_v43 = vld [vmem:[%s1046_s2 + $0x130] sm:$0xff]  ;;  %v32_v45 = vpack.c.bf16 %v25_v40, %v25_v40 }
   0xe   :  { %460 = vmatpush.bf16.msra.mxu1 %v782_v13  ;;  %v826_v42 = vld [vmem:[%s1046_s2 + $0x180] sm:$0xff]  ;;  %v824_v44 = vld [vmem:[%s1046_s2 + $0x170] sm:$0xff]  ;;  %v26_v47 = vld [vmem:[%s1049_s0 + $0x18] sm:$0xff] }
   0xf   :  { %473 = vmatpush.bf16.msra.mxu2 %v790_v14  ;;  %498 = vmatpush.bf16.msrb.mxu0 %v807_v17  ;;  %v802_v46 = vld [vmem:[%s1046_s2 + $0xc0] sm:$0xff]  ;;  %v815_v48 = vld [vmem:[%s1046_s2 + $0x128] sm:$0xff]  ;;  %v33_v50 = vpack.c.bf16 %v26_v47, %v26_v47  ;;  %v813_v53 = vld [vmem:[%s1046_s2 + $0x118] sm:$0xff] }
  0x10   :  { %486 = vmatpush.bf16.msra.mxu3 %v798_v15  ;;  %v823_v49 = vld [vmem:[%s1046_s2 + $0x168] sm:$0xff]  ;;  %v814_v51 = vld [vmem:[%s1046_s2 + $0x120] sm:$0xff]  ;;  %v821_v54 = vld [vmem:[%s1046_s2 + $0x158] sm:$0xff] }
  0x11   :  { %v822_v52 = vld [vmem:[%s1046_s2 + $0x160] sm:$0xff]  ;;  %v29_v55 = vld [vmem:[%s1049_s0 + $0x30] sm:$0xff]  ;;  %v811_v59 = vld [vmem:[%s1046_s2 + $0x108] sm:$0xff] }
  0x12   :  { %461 = vmatpush.bf16.msra.mxu1 %v781_v19  ;;  %v812_v56 = vld [vmem:[%s1046_s2 + $0x110] sm:$0xff]  ;;  %v36_v58 = vpack.c.bf16 %v29_v55, %v29_v55  ;;  %v819_v60 = vld [vmem:[%s1046_s2 + $0x148] sm:$0xff]  ;;  %v810_v61 = vld [vmem:[%s1046_s2 + $0x100] sm:$0xff] }
  0x13   :  { %474 = vmatpush.bf16.msra.mxu2 %v789_v20  ;;  %499 = vmatpush.bf16.msrb.mxu0 %v806_v22  ;;  %v820_v57 = vld [vmem:[%s1046_s2 + $0x150] sm:$0xff]  ;;  %v818_v62 = vld [vmem:[%s1046_s2 + $0x140] sm:$0xff]  ;;  %v28_v0 = vld [vmem:[%s1049_s0 + $0x28] sm:$0xff] }
  0x14   :  { %487 = vmatpush.bf16.msra.mxu3 %v797_v21  ;;  %v27_v63 = vld [vmem:[%s1049_s0 + $0x20] sm:$0xff]  ;;  %v35_v2 = vpack.c.bf16 %v28_v0, %v28_v0 }
  0x15   :  { %v34_v1 = vpack.c.bf16 %v27_v63, %v27_v63 }
  0x16   :  { %462 = vmatpush.bf16.msra.mxu1 %v780_v23  ;;  %v827_v23 = vld [vmem:[%s1050_s4] ss:$0 sm:$0xff] }
  0x17   :  { %475 = vmatpush.bf16.msra.mxu2 %v788_v24  ;;  %500 = vmatpush.bf16.msrb.mxu0 %v805_v26 }
  0x18   :  { %488 = vmatpush.bf16.msra.mxu3 %v796_v25 }
  0x1a   :  { %463 = vmatpush.bf16.msra.mxu1 %v779_v27 }
  0x1b   :  { %476 = vmatpush.bf16.msra.mxu2 %v787_v28  ;;  %501 = vmatpush.bf16.msrb.mxu0 %v804_v30 }
  0x1c   :  { %489 = vmatpush.bf16.msra.mxu3 %v795_v29 }
  0x1e   :  { %464 = vmatpush.bf16.msra.mxu1 %v778_v31 }
  0x1f   :  { %477 = vmatpush.bf16.msra.mxu2 %v786_v32  ;;  %502 = vmatpush.bf16.msrb.mxu0 %v803_v38 }
  0x20   :  { %490 = vmatpush.bf16.msra.mxu3 %v794_v37 }
  0x21   :  { %465 = vmatmul.bf16.vlgmr.msra.gmra.mxu1 %v30_v41 }
  0x22   :  { %509 = vmatpush.bf16.msrb.mxu1 %v817_v35  ;;  %478 = vmatmul.bf16.vlgmr.msra.gmra.mxu2 %v31_v39 }
  0x23   :  { %522 = vmatpush.bf16.msrb.mxu2 %v825_v36  ;;  %491 = vmatmul.bf16.vlgmr.msra.gmra.mxu3 %v32_v45 }
  0x24   :  { %542 = vmatpush.bf16.msrb.mxu3 %v826_v42  ;;  %503 = vmatpush.bf16.msrb.mxu0 %v802_v46 }
  0x26   :  { %510 = vmatpush.bf16.msrb.mxu1 %v816_v43 }
  0x27   :  { %523 = vmatpush.bf16.msrb.mxu2 %v824_v44  ;;  %504 = vmatmul.bf16.vlgmr.msrb.gmra.mxu0 %v33_v50 }
  0x2a   :  { %511 = vmatpush.bf16.msrb.mxu1 %v815_v48 }
  0x2b   :  { %524 = vmatpush.bf16.msrb.mxu2 %v823_v49 }
  0x2e   :  { %512 = vmatpush.bf16.msrb.mxu1 %v814_v51 }
  0x2f   :  { %525 = vmatpush.bf16.msrb.mxu2 %v822_v52 }
  0x32   :  { %513 = vmatpush.bf16.msrb.mxu1 %v813_v53 }
  0x33   :  { %526 = vmatpush.bf16.msrb.mxu2 %v821_v54  ;;  %777 = vmatmul.msk.bf16.vlgmr.msrb.gmra.mxu3 %vm453_vm2, %v36_v58 }
  0x36   :  { %514 = vmatpush.bf16.msrb.mxu1 %v812_v56 }
  0x37   :  { %527 = vmatpush.bf16.msrb.mxu2 %v820_v57 }
  0x3a   :  { %515 = vmatpush.bf16.msrb.mxu1 %v811_v59 }
  0x3b   :  { %528 = vmatpush.bf16.msrb.mxu2 %v819_v60 }
  0x3e   :  { %516 = vmatpush.bf16.msrb.mxu1 %v810_v61 }
  0x3f   :  { %529 = vmatpush.bf16.msrb.mxu2 %v818_v62 }
  0x41   :  { %517 = vmatmul.bf16.vlgmr.msrb.gmra.mxu1 %v34_v1 }
  0x42   :  { %530 = vmatmul.bf16.vlgmr.msrb.gmra.mxu2 %v35_v2 }
  0x89   :  { %v155_v3 = vpop.f32.mrf.mxu0 }
  0x91   :  { %v157_v4 = vpop.f32.mrf.mxu0 }
  0x9e   :  { %v466_v5 = vpop.f32.mrf.mxu1 }
  0x9f   :  { %v467_v13 = vadd.f32 %v466_v5, %v155_v3 }
  0xa4   :  { %v505_v7 = vpop.f32.mrf.mxu0 }
  0xa5   :  { %v479_v6 = vpop.f32.mrf.mxu2 }
  0xa6   :  { %v468_v8 = vpop.f32.mrf.mxu1  ;;  %v492_v9 = vpop.f32.mrf.mxu3  ;;  %v480_v14 = vadd.f32 %v479_v6, %v467_v13 }
  0xa8   :  { %v493_v16 = vadd.f32 %v492_v9, %v480_v14 }
  0xaa   :  { %v506_v18 = vadd.f32 %v505_v7, %v493_v16 }
  0xac   :  { %v507_v11 = vpop.f32.mrf.mxu0 }
  0xad   :  { %v481_v10 = vpop.f32.mrf.mxu2 }
  0xae   :  { %v494_v12 = vpop.f32.mrf.mxu3 }
  0xb6   :  { %v544_v15 = vpop.f32.mrf.mxu3 }
  0xbe   :  { %v518_v17 = vpop.f32.mrf.mxu1  ;;  %v546_v19 = vpop.f32.mrf.mxu3 }
  0xbf   :  { %v519_v20 = vadd.f32 %v518_v17, %v506_v18 }
  0xc5   :  { %v531_v21 = vpop.f32.mrf.mxu2 }
  0xc6   :  { %v532_v22 = vadd.f32 %v531_v21, %v519_v20  ;;  %v520_v24 = vpop.f32.mrf.mxu1 }
  0xc8   :  { %v545_v25 = vadd.f32 %v544_v15, %v532_v22 }
  0xca   :  { %v552_v26 = vadd.f32 %v827_v23, %v545_v25 }
  0xcc   :  { %v553_v27 = vmax.f32 %v552_v26, 0.0 }
  0xcd   :  { %v533_v28 = vpop.f32.mrf.mxu2 }
  0xce   :  { %v554_v29 = vrot.slane %v553_v27, 4  ;;  %v560_v30 = vmul.f32 %v553_v27, %v553_v27  ;;  %v570_v31 = vpack.c.bf16 %v553_v27, %v553_v27 }
  0xd0   :  { %v555_v32 = vadd.f32 %v554_v29, %v553_v27  ;;  %v561_v33 = vrot.slane %v560_v30, 4  ;;  %571 = vst [vmem:[%s1051_s5] sm:$0xf] %v570_v31 }
  0xd2   :  { %v556_v34 = vrot.slane %v555_v32, 2  ;;  %v562_v35 = vadd.f32 %v561_v33, %v560_v30 }
  0xd4   :  { %v557_v36 = vadd.f32 %v556_v34, %v555_v32  ;;  %v563_v37 = vrot.slane %v562_v35, 2 }
  0xd6   :  { %v558_v38 = vrot.slane %v557_v36, 1  ;;  %v564_v39 = vadd.f32 %v563_v37, %v562_v35 }
  0xd8   :  { %v565_v40 = vrot.slane %v564_v39, 1  ;;  %v559_v41 = vadd.f32 %v558_v38, %v557_v36 }
  0xda   :  { %v566_v42 = vadd.f32 %v565_v40, %v564_v39 }
  0xdc   :  { %v568_v43 = vsel %vm567_vm3, %v559_v41, %v566_v42 }
  0xdd   :  { %569 = vst [vmem:[%s1052_s6] sm:$0x3] %v568_v43 }

</bundles_post_ra>
